<compile_context>
chip_gen: v6e
topology: v6e:2x2x1
jax: 0.10.0
libtpu: 0.0.40
codegen_flags: <defaults>
</compile_context>

<pallas_src>
import jax
import jax.numpy as jnp
import numpy as np
from jax.experimental import pallas as pl
from jax.experimental.pallas import tpu as pltpu

# ---------------- configuration (small, consistent with the module) -----------
B = 2            # batch
C = 64           # encoder feature channels (in_chans of AttHead)
F = 8            # frequency bins of the encoder feature map
T = 12           # time frames of the encoder feature map
HID = 512        # hidden width of the dense layer (hard-coded 512 in AttHead)
CLASSES = 21     # num_class (AttModel default classes=21)
NPAD = 128       # class dim padded to a full lane tile (lane-dense outputs)
TRAIN_PERIOD = 15.0
INFER_PERIOD = 5.0
GEM_EPS = 1e-6

# Inference-branch time crop (exact torch arithmetic, baked in at trace time).
# NOTE: int() truncation matches torch for the positive values produced here.
_START_F = T / 2 - T * (INFER_PERIOD / TRAIN_PERIOD) / 2
_END_F = _START_F + T * (INFER_PERIOD / TRAIN_PERIOD)
CROP_START = int(_START_F)          # 4
CROP_END = int(_END_F)              # 8
TS = CROP_END - CROP_START          # 4
M = B * TS                          # 8 rows: batches folded into matmul M dim
SLAB = 2 * TS + 2                   # 10 output rows per batch: flogit|fattn|logit|clip


# ---------------- fused head kernel -------------------------------------------
def fused_head_kernel(p_ref, x_ref, w1_ref, b1_ref, wcat_ref, bcat_ref, out_ref):
    p = p_ref[0]                                    # GeM exponent (scalar, SMEM)
    inv_p = 1.0 / p

    # GeM over frequency for both batches at once.  Input is already time
    # cropped (Ts frames) and folded to (F, B*Ts, C) by the wrapper, so the
    # exp/log pow chain only touches the frames that are actually consumed.
    x = x_ref[...]                                  # (F, B*Ts, C) f32
    xc = jnp.maximum(x, GEM_EPS)
    xp = jnp.exp(p * jnp.log(xc))                   # xc ** p      (xc > 0)
    pooled = jnp.mean(xp, axis=0)                   # (B*Ts, C)    avg over freq
    pooled = jnp.exp(inv_p * jnp.log(pooled))       # ** (1/p)

    # Dropout == identity in eval; Linear(C -> 512) + ReLU.  One matmul for
    # both batches (M = 8 fills an exact sublane tile); bf16 weights, f32 acc.
    h = jnp.dot(pooled.astype(jnp.bfloat16), w1_ref[...],
                preferred_element_type=jnp.float32) + b1_ref[...]
    h = jnp.maximum(h, 0.0)                         # (B*Ts, HID) f32

    # attention + fix_scale 1x1 convs fused into one lane-dense matmul
    # (cols [0:128) = attention padded, [128:256) = fix_scale padded).
    af = jnp.dot(h.astype(jnp.bfloat16), wcat_ref[...],
                 preferred_element_type=jnp.float32) + bcat_ref[...]  # (B*Ts, 2*NPAD)
    time_att = jnp.tanh(af[:, :NPAD])               # (B*Ts, NPAD)
    fs = af[:, NPAD:]                               # (B*Ts, NPAD)
    sig = 1.0 / (1.0 + jnp.exp(-fs))

    # Per-batch softmax over the time axis (torch dim=-1 on (B, cls, T)) and
    # attention-weighted sums.  Static sublane slices; softmax weights never
    # materialized (single exact reciprocal per batch).
    for b in range(B):
        r0, r1 = b * TS, (b + 1) * TS
        ta = time_att[r0:r1]                        # (Ts, NPAD)
        fb = fs[r0:r1]
        sb = sig[r0:r1]
        mx = jnp.max(ta, axis=0, keepdims=True)
        e = jnp.exp(ta - mx)
        inv_den = pl.reciprocal(jnp.sum(e, axis=0, keepdims=True), approx=False)
        logit = jnp.sum(fb * e, axis=0, keepdims=True) * inv_den    # (1, NPAD)
        clip = jnp.sum(sb * e, axis=0, keepdims=True) * inv_den     # (1, NPAD)

        # Single lane-dense output slab per batch (one output array / one DMA):
        # rows 0:Ts = framewise logit, Ts:2Ts = framewise attn, 2Ts = logit,
        # 2Ts+1 = clipwise.
        out_ref[b, 0:TS, :] = fb
        out_ref[b, TS:2 * TS, :] = ta
        out_ref[b, 2 * TS:2 * TS + 1, :] = logit
        out_ref[b, 2 * TS + 1:2 * TS + 2, :] = clip


def att_head_fused(feat_bftc, params):
    # Inference-branch time crop applied BEFORE the kernel (exact: GeM pools
    # over frequency only and every later layer is pointwise in time), then
    # fold batch into the matmul M/time axis: (B,F,Ts,C) -> (F, B*Ts, C).
    feat = feat_bftc[:, :, CROP_START:CROP_END, :]                  # (B, F, Ts, C)
    x = jnp.transpose(feat, (1, 0, 2, 3)).reshape(F, M, C)          # (F, B*Ts, C)

    slab = pl.pallas_call(
        fused_head_kernel,
        out_shape=jax.ShapeDtypeStruct((B, SLAB, NPAD), jnp.float32),
        in_specs=[
            pl.BlockSpec(memory_space=pltpu.MemorySpace.SMEM),      # p (scalar)
            pl.BlockSpec(memory_space=pltpu.MemorySpace.VMEM),      # features
            pl.BlockSpec(memory_space=pltpu.MemorySpace.VMEM),      # W1 (bf16)
            pl.BlockSpec(memory_space=pltpu.MemorySpace.VMEM),      # b1
            pl.BlockSpec(memory_space=pltpu.MemorySpace.VMEM),      # [wa|wf] (bf16)
            pl.BlockSpec(memory_space=pltpu.MemorySpace.VMEM),      # [ba|bf]
        ],
        out_specs=pl.BlockSpec(memory_space=pltpu.MemorySpace.VMEM),
    )(params["p"], x, params["w1"], params["b1"], params["wcat"], params["bcat"])

    # Slice the consolidated slab back apart (fused by XLA under jit).
    flogit = slab[:, 0:TS, :CLASSES]                # (B, Ts, CLASSES)
    fattn = slab[:, TS:2 * TS, :CLASSES]            # (B, Ts, CLASSES)
    logit = slab[:, 2 * TS, :CLASSES]               # (B, CLASSES)
    clip = slab[:, 2 * TS + 1, :CLASSES]            # (B, CLASSES)
    return logit, clip, flogit, fattn


# ---------------- AttModel.forward (head part) --------------------------------
def att_model_forward(feat_bftc, params):
    # TODO(synk): log-mel front-end and resnet34 encoder not translated;
    # feat_bftc plays the role of self.features(logmelspec_extractor(input)),
    # already channels-last (B, F, T, C).
    logit, clip, flogit, fattn = att_head_fused(feat_bftc, params)
    return {
        "logit": logit,                    # (B, CLASSES)
        "clipwise_output": clip,           # (B, CLASSES)
        "framewise_logit": flogit,         # (B, Ts, CLASSES) == fix_scale(feat).permute(0,2,1)
        "framewise_attn": fattn,           # (B, Ts, CLASSES) == time_att.permute(0,2,1)
    }


def att_model_forward_nchw(feat_nchw, params):
    # Compatibility path for an NCHW encoder output (B, C, F, T).  Prefer
    # emitting the encoder features channels-last so this transpose disappears.
    return att_model_forward(jnp.transpose(feat_nchw, (0, 2, 3, 1)), params)


# ---------------- pure-JAX reference (mirrors the torch math, f32) ------------
def reference(x_bftc, params):
    # Uses the same bf16-stored weights (dequantized to f32), full-T math and
    # the original torch crop placement, so it validates the crop-early /
    # batch-fold / fused-matmul transforms of the kernel.
    p = params["p"][0]
    w1 = params["w1"].astype(jnp.float32)
    wa = params["wa"].astype(jnp.float32)
    wf = params["wf"].astype(jnp.float32)
    xp = jnp.maximum(x_bftc, GEM_EPS) ** p                  # (B,F,T,C)
    pooled = jnp.mean(xp, axis=1) ** (1.0 / p)              # (B,T,C)
    h = jnp.maximum(pooled @ w1 + params["b1"], 0.0)        # (B,T,HID)
    time_att_full = jnp.tanh(h @ wa + params["ba"])         # (B,T,CLASSES)
    ft = h.shape[1]
    start_f = ft / 2 - ft * (INFER_PERIOD / TRAIN_PERIOD) / 2
    end_f = start_f + ft * (INFER_PERIOD / TRAIN_PERIOD)
    start, end = int(start_f), int(end_f)
    h_s = h[:, start:end, :]
    time_att = time_att_full[:, start:end, :]
    fs = h_s @ wf + params["bf"]                            # (B,Ts,CLASSES)
    att = jax.nn.softmax(time_att, axis=1)
    clip = jnp.sum(jax.nn.sigmoid(fs) * att, axis=1)
    logit = jnp.sum(fs * att, axis=1)
    return logit, clip, fs, time_att


# ---------------- parameter init (deterministic, synthetic) -------------------
def make_params(key):
    ks = jax.random.split(key, 6)
    # Matmul weights stored in bf16 (DMA + MXU-pass savings); biases stay f32.
    w1 = (jax.random.normal(ks[0], (C, HID), jnp.float32) * 0.02).astype(jnp.bfloat16)
    b1 = jax.random.normal(ks[1], (1, HID), jnp.float32) * 0.01
    wa = (jax.random.normal(ks[2], (HID, CLASSES), jnp.float32) * 0.02).astype(jnp.bfloat16)
    ba = jax.random.normal(ks[3], (1, CLASSES), jnp.float32) * 0.01
    wf = (jax.random.normal(ks[4], (HID, CLASSES), jnp.float32) * 0.02).astype(jnp.bfloat16)
    bf = jax.random.normal(ks[5], (1, CLASSES), jnp.float32) * 0.01

    # Pre-pack attention|fix_scale into one lane-dense (HID, 2*NPAD) bf16 weight.
    wcat = jnp.zeros((HID, 2 * NPAD), jnp.bfloat16)
    wcat = wcat.at[:, :CLASSES].set(wa)
    wcat = wcat.at[:, NPAD:NPAD + CLASSES].set(wf)
    bcat = jnp.zeros((1, 2 * NPAD), jnp.float32)
    bcat = bcat.at[:, :CLASSES].set(ba)
    bcat = bcat.at[:, NPAD:NPAD + CLASSES].set(bf)

    return {
        "p": jnp.ones((1,), jnp.float32) * 3.0,   # GeMFreq p
        "w1": w1, "b1": b1,
        "wcat": wcat, "bcat": bcat,
        # unpacked copies kept only for the pure-JAX reference
        "wa": wa, "ba": ba, "wf": wf, "bf": bf,
    }


if __name__ == "__main__":
    key = jax.random.PRNGKey(0)
    k_feat, k_par = jax.random.split(key)
    # Stand-in for the encoder feature map, generated channels-last (B, F, T, C)
    # so the head kernel needs no relayout (NCHW view would be (B, C, F, T)).
    feat_bftc = jax.random.normal(k_feat, (B, F, T, C), jnp.float32)
    params = make_params(k_par)

    fwd = jax.jit(att_model_forward)
    outs = fwd(feat_bftc, params)
    outs = jax.tree_util.tree_map(jax.block_until_ready, outs)

    r_logit, r_clip, r_flogit, r_fattn = reference(feat_bftc, params)
    np.testing.assert_allclose(np.asarray(outs["logit"]), np.asarray(r_logit),
                               rtol=1e-3, atol=1e-3)
    np.testing.assert_allclose(np.asarray(outs["clipwise_output"]), np.asarray(r_clip),
                               rtol=1e-3, atol=1e-3)
    np.testing.assert_allclose(np.asarray(outs["framewise_logit"]), np.asarray(r_flogit),
                               rtol=1e-3, atol=1e-3)
    np.testing.assert_allclose(np.asarray(outs["framewise_attn"]), np.asarray(r_fattn),
                               rtol=1e-3, atol=1e-3)

    print("KERNEL_OK")
</pallas_src>

<mosaic_0001>
module attributes {stable_mosaic.version = 11 : i64} {
  func.func @fused_head_kernel(%arg0: memref<1xf32, #tpu.memory_space<smem>>, %arg1: memref<8x8x64xf32, #tpu.memory_space<vmem>>, %arg2: memref<64x512xbf16, #tpu.memory_space<vmem>>, %arg3: memref<1x512xf32, #tpu.memory_space<vmem>>, %arg4: memref<512x256xbf16, #tpu.memory_space<vmem>>, %arg5: memref<1x256xf32, #tpu.memory_space<vmem>>, %arg6: memref<2x10x128xf32, #tpu.memory_space<vmem>>) attributes {dimension_semantics = [], scalar_prefetch = 0 : i64, scratch_operands = 0 : i64, tpu.core_type = #tpu.core_type<tc>} {
    %c0 = arith.constant 0 : index
    %0 = memref.load %arg0[%c0] : memref<1xf32, #tpu.memory_space<smem>>
    %cst = arith.constant 1.000000e+00 : f32
    %1 = arith.divf %cst, %0 : f32
    %c0_0 = arith.constant 0 : index
    %c0_1 = arith.constant 0 : index
    %c0_2 = arith.constant 0 : index
    %2 = vector.load %arg1[%c0_0, %c0_1, %c0_2] : memref<8x8x64xf32, #tpu.memory_space<vmem>>, vector<8x8x64xf32>
    %cst_3 = arith.constant 9.99999997E-7 : f32
    %3 = vector.broadcast %cst_3 : f32 to vector<8x8x64xf32>
    %4 = arith.maximumf %2, %3 : vector<8x8x64xf32>
    %5 = math.log %4 : vector<8x8x64xf32>
    %6 = vector.broadcast %0 : f32 to vector<8x8x64xf32>
    %7 = arith.mulf %6, %5 : vector<8x8x64xf32>
    %8 = math.exp %7 : vector<8x8x64xf32>
    %cst_4 = arith.constant dense<0.000000e+00> : vector<8x64xf32>
    %9 = vector.multi_reduction <add>, %8, %cst_4 [0] : vector<8x8x64xf32> to vector<8x64xf32>
    %cst_5 = arith.constant 8.000000e+00 : f32
    %10 = vector.broadcast %cst_5 : f32 to vector<8x64xf32>
    %11 = arith.divf %9, %10 : vector<8x64xf32>
    %12 = math.log %11 : vector<8x64xf32>
    %13 = vector.broadcast %1 : f32 to vector<8x64xf32>
    %14 = arith.mulf %13, %12 : vector<8x64xf32>
    %15 = math.exp %14 : vector<8x64xf32>
    %16 = arith.truncf %15 : vector<8x64xf32> to vector<8x64xbf16>
    %c0_6 = arith.constant 0 : index
    %c0_7 = arith.constant 0 : index
    %17 = vector.load %arg2[%c0_6, %c0_7] : memref<64x512xbf16, #tpu.memory_space<vmem>>, vector<64x512xbf16>
    %cst_8 = arith.constant dense<0.000000e+00> : vector<8x512xf32>
    %18 = tpu.matmul %16, %17, %cst_8 {dimension_numbers = #tpu.dot_dimension_numbers<[1], [0], [0], [1], [0, 0, 1, 1], [], []>} : vector<8x64xbf16>, vector<64x512xbf16>, vector<8x512xf32> -> vector<8x512xf32>
    %c0_9 = arith.constant 0 : index
    %c0_10 = arith.constant 0 : index
    %19 = vector.load %arg3[%c0_9, %c0_10] : memref<1x512xf32, #tpu.memory_space<vmem>>, vector<1x512xf32>
    %20 = vector.broadcast %19 : vector<1x512xf32> to vector<8x512xf32>
    %21 = arith.addf %18, %20 : vector<8x512xf32>
    %cst_11 = arith.constant 0.000000e+00 : f32
    %22 = vector.broadcast %cst_11 : f32 to vector<8x512xf32>
    %23 = arith.maximumf %21, %22 : vector<8x512xf32>
    %24 = arith.truncf %23 : vector<8x512xf32> to vector<8x512xbf16>
    %c0_12 = arith.constant 0 : index
    %c0_13 = arith.constant 0 : index
    %25 = vector.load %arg4[%c0_12, %c0_13] : memref<512x256xbf16, #tpu.memory_space<vmem>>, vector<512x256xbf16>
    %cst_14 = arith.constant dense<0.000000e+00> : vector<8x256xf32>
    %26 = tpu.matmul %24, %25, %cst_14 {dimension_numbers = #tpu.dot_dimension_numbers<[1], [0], [0], [1], [0, 0, 1, 1], [], []>} : vector<8x512xbf16>, vector<512x256xbf16>, vector<8x256xf32> -> vector<8x256xf32>
    %c0_15 = arith.constant 0 : index
    %c0_16 = arith.constant 0 : index
    %27 = vector.load %arg5[%c0_15, %c0_16] : memref<1x256xf32, #tpu.memory_space<vmem>>, vector<1x256xf32>
    %28 = vector.broadcast %27 : vector<1x256xf32> to vector<8x256xf32>
    %29 = arith.addf %26, %28 : vector<8x256xf32>
    %30 = vector.extract_strided_slice %29 {offsets = [0, 0], sizes = [8, 128], strides = [1, 1]} : vector<8x256xf32> to vector<8x128xf32>
    %31 = math.tanh %30 : vector<8x128xf32>
    %32 = vector.extract_strided_slice %29 {offsets = [0, 128], sizes = [8, 128], strides = [1, 1]} : vector<8x256xf32> to vector<8x128xf32>
    %cst_17 = arith.constant 0.000000e+00 : f32
    %33 = vector.broadcast %cst_17 : f32 to vector<8x128xf32>
    %34 = arith.subf %33, %32 : vector<8x128xf32>
    %35 = math.exp %34 : vector<8x128xf32>
    %cst_18 = arith.constant 1.000000e+00 : f32
    %36 = vector.broadcast %cst_18 : f32 to vector<8x128xf32>
    %37 = arith.addf %36, %35 : vector<8x128xf32>
    %cst_19 = arith.constant 1.000000e+00 : f32
    %38 = vector.broadcast %cst_19 : f32 to vector<8x128xf32>
    %39 = arith.divf %38, %37 : vector<8x128xf32>
    %40 = vector.extract_strided_slice %31 {offsets = [0, 0], sizes = [4, 128], strides = [1, 1]} : vector<8x128xf32> to vector<4x128xf32>
    %41 = vector.extract_strided_slice %32 {offsets = [0, 0], sizes = [4, 128], strides = [1, 1]} : vector<8x128xf32> to vector<4x128xf32>
    %42 = vector.extract_strided_slice %39 {offsets = [0, 0], sizes = [4, 128], strides = [1, 1]} : vector<8x128xf32> to vector<4x128xf32>
    %cst_20 = arith.constant dense<0xFF800000> : vector<128xf32>
    %43 = vector.multi_reduction <maximumf>, %40, %cst_20 [0] : vector<4x128xf32> to vector<128xf32>
    %44 = vector.shape_cast %43 : vector<128xf32> to vector<1x128xf32>
    %45 = vector.broadcast %44 : vector<1x128xf32> to vector<4x128xf32>
    %46 = arith.subf %40, %45 : vector<4x128xf32>
    %47 = math.exp %46 : vector<4x128xf32>
    %cst_21 = arith.constant dense<0.000000e+00> : vector<128xf32>
    %48 = vector.multi_reduction <add>, %47, %cst_21 [0] : vector<4x128xf32> to vector<128xf32>
    %49 = vector.shape_cast %48 : vector<128xf32> to vector<1x128xf32>
    %50 = tpu.reciprocal %49 : vector<1x128xf32> -> vector<1x128xf32>
    %51 = arith.mulf %41, %47 : vector<4x128xf32>
    %cst_22 = arith.constant dense<0.000000e+00> : vector<128xf32>
    %52 = vector.multi_reduction <add>, %51, %cst_22 [0] : vector<4x128xf32> to vector<128xf32>
    %53 = vector.shape_cast %52 : vector<128xf32> to vector<1x128xf32>
    %54 = arith.mulf %53, %50 : vector<1x128xf32>
    %55 = arith.mulf %42, %47 : vector<4x128xf32>
    %cst_23 = arith.constant dense<0.000000e+00> : vector<128xf32>
    %56 = vector.multi_reduction <add>, %55, %cst_23 [0] : vector<4x128xf32> to vector<128xf32>
    %57 = vector.shape_cast %56 : vector<128xf32> to vector<1x128xf32>
    %58 = arith.mulf %57, %50 : vector<1x128xf32>
    %c0_24 = arith.constant 0 : index
    %c0_25 = arith.constant 0 : index
    %c0_26 = arith.constant 0 : index
    %59 = vector.load %arg6[%c0_24, %c0_25, %c0_26] : memref<2x10x128xf32, #tpu.memory_space<vmem>>, vector<1x4x128xf32>
    %60 = vector.shape_cast %59 : vector<1x4x128xf32> to vector<4x128xf32>
    %61 = vector.shape_cast %41 : vector<4x128xf32> to vector<1x4x128xf32>
    tpu.vector_store %arg6[%c0_24, %c0_25, %c0_26], %61 {strides = array<i32>} : memref<2x10x128xf32, #tpu.memory_space<vmem>>, vector<1x4x128xf32>,
    %c0_27 = arith.constant 0 : index
    %c4 = arith.constant 4 : index
    %c0_28 = arith.constant 0 : index
    %62 = vector.load %arg6[%c0_27, %c4, %c0_28] : memref<2x10x128xf32, #tpu.memory_space<vmem>>, vector<1x4x128xf32>
    %63 = vector.shape_cast %62 : vector<1x4x128xf32> to vector<4x128xf32>
    %64 = vector.shape_cast %40 : vector<4x128xf32> to vector<1x4x128xf32>
    tpu.vector_store %arg6[%c0_27, %c4, %c0_28], %64 {strides = array<i32>} : memref<2x10x128xf32, #tpu.memory_space<vmem>>, vector<1x4x128xf32>,
    %c0_29 = arith.constant 0 : index
    %c8 = arith.constant 8 : index
    %c0_30 = arith.constant 0 : index
    %65 = vector.load %arg6[%c0_29, %c8, %c0_30] : memref<2x10x128xf32, #tpu.memory_space<vmem>>, vector<1x1x128xf32>
    %66 = vector.shape_cast %65 : vector<1x1x128xf32> to vector<1x128xf32>
    %67 = vector.shape_cast %54 : vector<1x128xf32> to vector<1x1x128xf32>
    tpu.vector_store %arg6[%c0_29, %c8, %c0_30], %67 {strides = array<i32>} : memref<2x10x128xf32, #tpu.memory_space<vmem>>, vector<1x1x128xf32>,
    %c0_31 = arith.constant 0 : index
    %c9 = arith.constant 9 : index
    %c0_32 = arith.constant 0 : index
    %68 = vector.load %arg6[%c0_31, %c9, %c0_32] : memref<2x10x128xf32, #tpu.memory_space<vmem>>, vector<1x1x128xf32>
    %69 = vector.shape_cast %68 : vector<1x1x128xf32> to vector<1x128xf32>
    %70 = vector.shape_cast %58 : vector<1x128xf32> to vector<1x1x128xf32>
    tpu.vector_store %arg6[%c0_31, %c9, %c0_32], %70 {strides = array<i32>} : memref<2x10x128xf32, #tpu.memory_space<vmem>>, vector<1x1x128xf32>,
    %71 = vector.extract_strided_slice %31 {offsets = [4, 0], sizes = [4, 128], strides = [1, 1]} : vector<8x128xf32> to vector<4x128xf32>
    %72 = vector.extract_strided_slice %32 {offsets = [4, 0], sizes = [4, 128], strides = [1, 1]} : vector<8x128xf32> to vector<4x128xf32>
    %73 = vector.extract_strided_slice %39 {offsets = [4, 0], sizes = [4, 128], strides = [1, 1]} : vector<8x128xf32> to vector<4x128xf32>
    %cst_33 = arith.constant dense<0xFF800000> : vector<128xf32>
    %74 = vector.multi_reduction <maximumf>, %71, %cst_33 [0] : vector<4x128xf32> to vector<128xf32>
    %75 = vector.shape_cast %74 : vector<128xf32> to vector<1x128xf32>
    %76 = vector.broadcast %75 : vector<1x128xf32> to vector<4x128xf32>
    %77 = arith.subf %71, %76 : vector<4x128xf32>
    %78 = math.exp %77 : vector<4x128xf32>
    %cst_34 = arith.constant dense<0.000000e+00> : vector<128xf32>
    %79 = vector.multi_reduction <add>, %78, %cst_34 [0] : vector<4x128xf32> to vector<128xf32>
    %80 = vector.shape_cast %79 : vector<128xf32> to vector<1x128xf32>
    %81 = tpu.reciprocal %80 : vector<1x128xf32> -> vector<1x128xf32>
    %82 = arith.mulf %72, %78 : vector<4x128xf32>
    %cst_35 = arith.constant dense<0.000000e+00> : vector<128xf32>
    %83 = vector.multi_reduction <add>, %82, %cst_35 [0] : vector<4x128xf32> to vector<128xf32>
    %84 = vector.shape_cast %83 : vector<128xf32> to vector<1x128xf32>
    %85 = arith.mulf %84, %81 : vector<1x128xf32>
    %86 = arith.mulf %73, %78 : vector<4x128xf32>
    %cst_36 = arith.constant dense<0.000000e+00> : vector<128xf32>
    %87 = vector.multi_reduction <add>, %86, %cst_36 [0] : vector<4x128xf32> to vector<128xf32>
    %88 = vector.shape_cast %87 : vector<128xf32> to vector<1x128xf32>
    %89 = arith.mulf %88, %81 : vector<1x128xf32>
    %c1 = arith.constant 1 : index
    %c0_37 = arith.constant 0 : index
    %c0_38 = arith.constant 0 : index
    %90 = vector.load %arg6[%c1, %c0_37, %c0_38] : memref<2x10x128xf32, #tpu.memory_space<vmem>>, vector<1x4x128xf32>
    %91 = vector.shape_cast %90 : vector<1x4x128xf32> to vector<4x128xf32>
    %92 = vector.shape_cast %72 : vector<4x128xf32> to vector<1x4x128xf32>
    tpu.vector_store %arg6[%c1, %c0_37, %c0_38], %92 {strides = array<i32>} : memref<2x10x128xf32, #tpu.memory_space<vmem>>, vector<1x4x128xf32>,
    %c1_39 = arith.constant 1 : index
    %c4_40 = arith.constant 4 : index
    %c0_41 = arith.constant 0 : index
    %93 = vector.load %arg6[%c1_39, %c4_40, %c0_41] : memref<2x10x128xf32, #tpu.memory_space<vmem>>, vector<1x4x128xf32>
    %94 = vector.shape_cast %93 : vector<1x4x128xf32> to vector<4x128xf32>
    %95 = vector.shape_cast %71 : vector<4x128xf32> to vector<1x4x128xf32>
    tpu.vector_store %arg6[%c1_39, %c4_40, %c0_41], %95 {strides = array<i32>} : memref<2x10x128xf32, #tpu.memory_space<vmem>>, vector<1x4x128xf32>,
    %c1_42 = arith.constant 1 : index
    %c8_43 = arith.constant 8 : index
    %c0_44 = arith.constant 0 : index
    %96 = vector.load %arg6[%c1_42, %c8_43, %c0_44] : memref<2x10x128xf32, #tpu.memory_space<vmem>>, vector<1x1x128xf32>
    %97 = vector.shape_cast %96 : vector<1x1x128xf32> to vector<1x128xf32>
    %98 = vector.shape_cast %85 : vector<1x128xf32> to vector<1x1x128xf32>
    tpu.vector_store %arg6[%c1_42, %c8_43, %c0_44], %98 {strides = array<i32>} : memref<2x10x128xf32, #tpu.memory_space<vmem>>, vector<1x1x128xf32>,
    %c1_45 = arith.constant 1 : index
    %c9_46 = arith.constant 9 : index
    %c0_47 = arith.constant 0 : index
    %99 = vector.load %arg6[%c1_45, %c9_46, %c0_47] : memref<2x10x128xf32, #tpu.memory_space<vmem>>, vector<1x1x128xf32>
    %100 = vector.shape_cast %99 : vector<1x1x128xf32> to vector<1x128xf32>
    %101 = vector.shape_cast %89 : vector<1x128xf32> to vector<1x1x128xf32>
    tpu.vector_store %arg6[%c1_45, %c9_46, %c0_47], %101 {strides = array<i32>} : memref<2x10x128xf32, #tpu.memory_space<vmem>>, vector<1x1x128xf32>,
    return
  }
}

</mosaic_0001>

<bundles_post_ra>
// kernel: att_model_forward.1
= control target key start
LH: loop header
LB: loop body
LE: loop exit
PB: predicated region body
PF: predicated region fallthrough
CT: control target
= control target key end

     0   :  { %12 = vsyncpa [#allocation4], 0  ;;  %s1204_s21 = smov [#allocation3]   ;;  %s1373_s0 = inlined_call_operand.<no memory space> [shape: f32[1], index: 0, kind: input, shape index: {}]   ;;  %s1374_s1 = inlined_call_operand.vmem [shape: f32[8,8,64], index: 1, kind: input, shape index: {}]   ;;  %s1375_s2 = inlined_call_operand.vmem [shape: bf16[64,512], index: 2, kind: input, shape index: {}]   ;;  %s1376_s3 = inlined_call_operand.vmem [shape: f32[1,512], index: 3, kind: input, shape index: {}]   ;;  %s1377_s4 = inlined_call_operand.hbm [shape: bf16[512,256], index: 4, kind: input, shape index: {}]   ;;  %s1378_s5 = inlined_call_operand.vmem [shape: f32[1,256], index: 5, kind: input, shape index: {}]   ;;  %s1379_s6 = inlined_call_operand.vmem [shape: f32[2,10,128], index: 6, kind: output, shape index: {}]  }
   0x1   :  { %s26_s22 = sshll.u32 %s1204_s21, 4  ;;  %s27_s22 = int_to_ptr.vmem [resolvable:$true] %s26_s22 }
   0x2   :  { %s1190_s23 = scalar_lea.vmem %s27_s22, 8192  ;;  %p1195_p1 = scmp.lt.s32.totalorder %s27_s22, %s27_s22 }
   0x3   :  { %p1191_p0 = scmp.ne.s32.totalorder %s27_s22, %s1190_s23  ;;  %p1196_p2 = scmp.lt.s32.totalorder %s1190_s23, %s1190_s23 }
   0x5   :  { %p1197_p3 = por %p1196_p2, %p1195_p1 }
   0x7   :  { %p1198_p4 = pnand %p1197_p3, %p1191_p0 }
   0x9   :  { %1201 = shalt.err (!%p1198_p4)
}
   0xa   :  { %s1205_s24 = smov 128   ;;  %s1206_s25 = smov 8  }
   0xb   :  { %32 = dma.hbm_to_vmem [thread:$0]  %s1377_s4, 8192, %s27_s22, [#allocation4], %s1205_s24, %s1205_s24, %s1206_s25  }
   0xc   :  { %1202 = dma.done.wait [#allocation4], 8192  }
   0xd   :  { %1203 = vsyncadd [#allocation4], 4294959104  ;;  %v1249_v0 = vstv %s1373_s0  ;;  %v1207_v1 = vmov 0   ;;  %v43_v2 = vld [vmem:[%s1374_s1] sm:$0xff]  ;;  %v44_v3 = vld [vmem:[%s1374_s1 + $0x8] sm:$0xff]  ;;  %vm100_vm0 = vcmask 523264  }
   0xe   :  { %1130 = vrcp.f32 %v1249_v0  ;;  %278 = vmatprep.mubr.bf16.mxu0 %v1207_v1  ;;  %319 = vmatprep.mubr.bf16.mxu1 %v1207_v1  ;;  %v45_v4 = vld [vmem:[%s1374_s1 + $0x10] sm:$0xff]  ;;  %v46_v5 = vld [vmem:[%s1374_s1 + $0x18] sm:$0xff]  ;;  %v47_v6 = vld [vmem:[%s1374_s1 + $0x20] sm:$0xff]  ;;  %v51_v8 = vmax.f32 %v43_v2, 1e-06  ;;  %vm821_vm1 = vcmask 1043456  }
   0xf   :  { %v48_v7 = vld [vmem:[%s1374_s1 + $0x28] sm:$0xff]  ;;  %v49_v9 = vld [vmem:[%s1374_s1 + $0x30] sm:$0xff]  ;;  %v50_v10 = vld [vmem:[%s1374_s1 + $0x38] sm:$0xff]  ;;  %v52_v11 = vmax.f32 %v44_v3, 1e-06  ;;  %vm862_vm2 = vcmask 1047556  }
  0x10   :  { %v53_v12 = vmax.f32 %v45_v4, 1e-06  ;;  %v54_v13 = vmax.f32 %v46_v5, 1e-06  ;;  %v55_v14 = vmax.f32 %v47_v6, 1e-06  ;;  %1132 = vlog2.f32 %v51_v8 }
  0x11   :  { %v56_v15 = vmax.f32 %v48_v7, 1e-06  ;;  %v57_v16 = vmax.f32 %v49_v9, 1e-06  ;;  %1134 = vlog2.f32 %v52_v11  ;;  %v58_v17 = vmax.f32 %v50_v10, 1e-06 }
  0x12   :  { %1136 = vlog2.f32 %v53_v12  ;;  %v1010_v18 = vld [vmem:[%s1375_s2 + $0x64] ss:$16 sps:$4 sm:$0xff]   ;;  %v1012_v19 = vld [vmem:[%s1375_s2 + $0x6c] ss:$16 sps:$4 sm:$0xff]   ;;  %v1014_v20 = vld [vmem:[%s1375_s2 + $0x60] ss:$16 sps:$4 sm:$0xff]  }
  0x13   :  { %1138 = vlog2.f32 %v54_v13  ;;  %v1015_v21 = vld [vmem:[%s1375_s2 + $0x68] ss:$16 sps:$4 sm:$0xff]   ;;  %254 = vmatprep.subr.bf16.mxu0 %v1010_v18  ;;  %v1016_v23 = vld [vmem:[%s1375_s2 + $0x44] ss:$16 sps:$4 sm:$0xff]   ;;  %295 = vmatprep.subr.bf16.mxu1 %v1012_v19  ;;  %v1018_v24 = vld [vmem:[%s1375_s2 + $0x4c] ss:$16 sps:$4 sm:$0xff]  }
  0x14   :  { %1140 = vlog2.f32 %v55_v14  ;;  %255 = vmatpush1.bf16.msra.mxu0 %v1014_v20  ;;  %296 = vmatpush1.bf16.msra.mxu1 %v1015_v21  ;;  %v1020_v25 = vld [vmem:[%s1375_s2 + $0x40] ss:$16 sps:$4 sm:$0xff]   ;;  %v1021_v26 = vld [vmem:[%s1375_s2 + $0x48] ss:$16 sps:$4 sm:$0xff]   ;;  %v1022_v27 = vld [vmem:[%s1375_s2 + $0x24] ss:$16 sps:$4 sm:$0xff]  }
  0x15   :  { %1142 = vlog2.f32 %v56_v15  ;;  %256 = vmatprep.subr.bf16.mxu0 %v1016_v23  ;;  %297 = vmatprep.subr.bf16.mxu1 %v1018_v24  ;;  %v1024_v28 = vld [vmem:[%s1375_s2 + $0x2c] ss:$16 sps:$4 sm:$0xff]   ;;  %v1026_v29 = vld [vmem:[%s1375_s2 + $0x20] ss:$16 sps:$4 sm:$0xff]   ;;  %v1027_v30 = vld [vmem:[%s1375_s2 + $0x28] ss:$16 sps:$4 sm:$0xff]  }
  0x16   :  { %1144 = vlog2.f32 %v57_v16  ;;  %v1028_v31 = vld [vmem:[%s1375_s2 + $0x4] ss:$16 sps:$4 sm:$0xff]   ;;  %v1030_v32 = vld [vmem:[%s1375_s2 + $0xc] ss:$16 sps:$4 sm:$0xff]   ;;  %v1032_v34 = vld [vmem:[%s1375_s2] ss:$16 sps:$4 sm:$0xff]  }
  0x17   :  { %1146 = vlog2.f32 %v58_v17  ;;  %v1033_v37 = vld [vmem:[%s1375_s2 + $0x8] ss:$16 sps:$4 sm:$0xff]   ;;  %v1036_v38 = vld [vmem:[#allocation3 + $0x74] ss:$8 sps:$4 sm:$0xff]  }
  0x18   :  { %257 = vmatpush1.bf16.msra.mxu0 %v1020_v25  ;;  %298 = vmatpush1.bf16.msra.mxu1 %v1021_v26  ;;  %v1039_v41 = vld [vmem:[#allocation3 + $0x174] ss:$8 sps:$4 sm:$0xff]  }
  0x19   :  { %258 = vmatprep.subr.bf16.mxu0 %v1022_v27  ;;  %299 = vmatprep.subr.bf16.mxu1 %v1024_v28 }
  0x1b   :  { %v1131_v22 = vpop.eup %1130 }
  0x1c   :  { %1004 = vpush %v1131_v22  ;;  %259 = vmatpush1.bf16.msra.mxu0 %v1026_v29  ;;  %300 = vmatpush1.bf16.msra.mxu1 %v1027_v30 }
  0x1d   :  { %v1133_v33 = vpop.eup %1132  ;;  %260 = vmatprep.subr.bf16.mxu0 %v1028_v31  ;;  %301 = vmatprep.subr.bf16.mxu1 %v1030_v32 }
  0x1e   :  { %v1135_v35 = vpop.eup %1134  ;;  %v60_v36 = vmul.f32 0.6931472, %v1133_v33 }
  0x1f   :  { %v1137_v39 = vpop.eup %1136  ;;  %v62_v40 = vmul.f32 0.6931472, %v1135_v35  ;;  %v1034_v35 = vld [vmem:[#allocation3 + $0x70] ss:$8 sps:$4 sm:$0xff]  }
  0x20   :  { %v1139_v42 = vpop.eup %1138  ;;  %v64_v43 = vmul.f32 0.6931472, %v1137_v39  ;;  %v76_v44 = vmul.f32 %v60_v36, %v1249_v0  ;;  %261 = vmatpush1.bf16.msra.mxu0 %v1032_v34  ;;  %302 = vmatpush1.bf16.msra.mxu1 %v1033_v37  ;;  %v1037_v36 = vld [vmem:[#allocation3 + $0x170] ss:$8 sps:$4 sm:$0xff]   ;;  %v1045_v39 = vld [vmem:[#allocation3 + $0x164] ss:$8 sps:$4 sm:$0xff]  }
  0x21   :  { %v1141_v45 = vpop.eup %1140  ;;  %v66_v46 = vmul.f32 0.6931472, %v1139_v42  ;;  %v77_v47 = vmul.f32 %v62_v40, %v1249_v0  ;;  %732 = vmatprep.subr.bf16.mxu0 %v1036_v38  ;;  %773 = vmatprep.subr.bf16.mxu1 %v1039_v41  ;;  %v1042_v38 = vld [vmem:[#allocation3 + $0x64] ss:$8 sps:$4 sm:$0xff]   ;;  %v1040_v40 = vld [vmem:[#allocation3 + $0x60] ss:$8 sps:$4 sm:$0xff]  }
  0x22   :  { %v1143_v48 = vpop.eup %1142  ;;  %v68_v49 = vmul.f32 0.6931472, %v1141_v45  ;;  %v78_v50 = vmul.f32 %v64_v43, %v1249_v0  ;;  %v84_v51 = vmul.f32 1.442695, %v76_v44  ;;  %v1043_v41 = vld [vmem:[#allocation3 + $0x160] ss:$8 sps:$4 sm:$0xff]  }
  0x23   :  { %v1145_v52 = vpop.eup %1144  ;;  %v70_v53 = vmul.f32 0.6931472, %v1143_v48  ;;  %v79_v54 = vmul.f32 %v66_v46, %v1249_v0  ;;  %v86_v55 = vmul.f32 1.442695, %v77_v47  ;;  %v1048_v42 = vld [vmem:[#allocation3 + $0x54] ss:$8 sps:$4 sm:$0xff]  }
  0x24   :  { %v1147_v56 = vpop.eup %1146  ;;  %v72_v57 = vmul.f32 0.6931472, %v1145_v52  ;;  %v80_v58 = vmul.f32 %v68_v49, %v1249_v0  ;;  %1148 = vpow2.f32 %v84_v51  ;;  %v88_v59 = vmul.f32 1.442695, %v78_v50  ;;  %v1051_v43 = vld [vmem:[#allocation3 + $0x154] ss:$8 sps:$4 sm:$0xff]  }
  0x25   :  { %v74_v60 = vmul.f32 0.6931472, %v1147_v56  ;;  %v81_v61 = vmul.f32 %v70_v53, %v1249_v0  ;;  %1150 = vpow2.f32 %v86_v55  ;;  %v90_v62 = vmul.f32 1.442695, %v79_v54  ;;  %v1046_v44 = vld [vmem:[#allocation3 + $0x50] ss:$8 sps:$4 sm:$0xff]  }
  0x26   :  { %v82_v63 = vmul.f32 %v72_v57, %v1249_v0  ;;  %1152 = vpow2.f32 %v88_v59  ;;  %v92_v1 = vmul.f32 1.442695, %v80_v58  ;;  %v1049_v45 = vld [vmem:[#allocation3 + $0x150] ss:$8 sps:$4 sm:$0xff]   ;;  %v1054_v46 = vld [vmem:[#allocation3 + $0x44] ss:$8 sps:$4 sm:$0xff]  }
  0x27   :  { %v83_v2 = vmul.f32 %v74_v60, %v1249_v0  ;;  %1154 = vpow2.f32 %v90_v62  ;;  %v94_v3 = vmul.f32 1.442695, %v81_v61  ;;  %v1057_v47 = vld [vmem:[#allocation3 + $0x144] ss:$8 sps:$4 sm:$0xff]   ;;  %v1052_v48 = vld [vmem:[#allocation3 + $0x40] ss:$8 sps:$4 sm:$0xff]  }
  0x28   :  { %1156 = vpow2.f32 %v92_v1  ;;  %v96_v4 = vmul.f32 1.442695, %v82_v63  ;;  %v1055_v49 = vld [vmem:[#allocation3 + $0x140] ss:$8 sps:$4 sm:$0xff]   ;;  %v1060_v50 = vld [vmem:[#allocation3 + $0x34] ss:$8 sps:$4 sm:$0xff]  }
  0x29   :  { %1158 = vpow2.f32 %v94_v3  ;;  %v98_v5 = vmul.f32 1.442695, %v83_v2  ;;  %v1063_v51 = vld [vmem:[#allocation3 + $0x134] ss:$8 sps:$4 sm:$0xff]   ;;  %v1058_v52 = vld [vmem:[#allocation3 + $0x30] ss:$8 sps:$4 sm:$0xff]  }
  0x2a   :  { %1160 = vpow2.f32 %v96_v4  ;;  %v1061_v53 = vld [vmem:[#allocation3 + $0x130] ss:$8 sps:$4 sm:$0xff]   ;;  %v1066_v54 = vld [vmem:[#allocation3 + $0x24] ss:$8 sps:$4 sm:$0xff]   ;;  %v1064_v56 = vld [vmem:[#allocation3 + $0x20] ss:$8 sps:$4 sm:$0xff]  }
  0x2b   :  { %1162 = vpow2.f32 %v98_v5  ;;  %v1069_v55 = vld [vmem:[#allocation3 + $0x124] ss:$8 sps:$4 sm:$0xff]   ;;  %v1067_v57 = vld [vmem:[#allocation3 + $0x120] ss:$8 sps:$4 sm:$0xff]   ;;  %v1072_v58 = vld [vmem:[#allocation3 + $0x14] ss:$8 sps:$4 sm:$0xff]  }
  0x2c   :  { %v1075_v59 = vld [vmem:[#allocation3 + $0x114] ss:$8 sps:$4 sm:$0xff]   ;;  %v1070_v60 = vld [vmem:[#allocation3 + $0x10] ss:$8 sps:$4 sm:$0xff]   ;;  %v1078_v62 = vld [vmem:[#allocation3 + $0x4] ss:$8 sps:$4 sm:$0xff]  }
  0x2d   :  { %v1073_v61 = vld [vmem:[#allocation3 + $0x110] ss:$8 sps:$4 sm:$0xff]   ;;  %v1081_v63 = vld [vmem:[#allocation3 + $0x104] ss:$8 sps:$4 sm:$0xff]   ;;  %v1076_v1 = vld [vmem:[#allocation3] ss:$8 sps:$4 sm:$0xff]  }
  0x2e   :  { %v1079_v2 = vld [vmem:[#allocation3 + $0x100] ss:$8 sps:$4 sm:$0xff]   ;;  %v1084_v3 = vld [vmem:[#allocation3 + $0xf4] ss:$8 sps:$4 sm:$0xff]   ;;  %v1082_v5 = vld [vmem:[#allocation3 + $0xf0] ss:$8 sps:$4 sm:$0xff]  }
  0x2f   :  { %v1087_v4 = vld [vmem:[#allocation3 + $0x1f4] ss:$8 sps:$4 sm:$0xff]  }
  0x31   :  { %v1149_v6 = vpop.eup %1148 }
  0x32   :  { %v1151_v7 = vpop.eup %1150  ;;  %v101_v8 = vsel %vm100_vm0, %v1149_v6, 0.0  ;;  %v1085_v6 = vld [vmem:[#allocation3 + $0x1f0] ss:$8 sps:$4 sm:$0xff]  }
  0x33   :  { %v1153_v9 = vpop.eup %1152  ;;  %v102_v10 = vsel %vm100_vm0, %v1151_v7, 0.0  ;;  %v1090_v7 = vld [vmem:[#allocation3 + $0xe4] ss:$8 sps:$4 sm:$0xff]  }
  0x34   :  { %v1155_v11 = vpop.eup %1154  ;;  %v103_v12 = vadd.f32 %v102_v10, %v101_v8  ;;  %v104_v0 = vsel %vm100_vm0, %v1153_v9, 0.0  ;;  %v1093_v8 = vld [vmem:[#allocation3 + $0x1e4] ss:$8 sps:$4 sm:$0xff]   ;;  %v1088_v9 = vld [vmem:[#allocation3 + $0xe0] ss:$8 sps:$4 sm:$0xff]  }
  0x35   :  { %v1157_v13 = vpop.eup %1156  ;;  %v106_v14 = vsel %vm100_vm0, %v1155_v11, 0.0  ;;  %v1091_v10 = vld [vmem:[#allocation3 + $0x1e0] ss:$8 sps:$4 sm:$0xff]   ;;  %v1096_v11 = vld [vmem:[#allocation3 + $0xd4] ss:$8 sps:$4 sm:$0xff]  }
  0x36   :  { %v1159_v15 = vpop.eup %1158  ;;  %v105_v16 = vadd.f32 %v104_v0, %v103_v12  ;;  %v108_v17 = vsel %vm100_vm0, %v1157_v13, 0.0  ;;  %v1099_v12 = vld [vmem:[#allocation3 + $0x1d4] ss:$8 sps:$4 sm:$0xff]   ;;  %v1094_v0 = vld [vmem:[#allocation3 + $0xd0] ss:$8 sps:$4 sm:$0xff]  }
  0x37   :  { %v1161_v18 = vpop.eup %1160  ;;  %v110_v20 = vsel %vm100_vm0, %v1159_v15, 0.0  ;;  %v1097_v13 = vld [vmem:[#allocation3 + $0x1d0] ss:$8 sps:$4 sm:$0xff]   ;;  %v1105_v15 = vld [vmem:[#allocation3 + $0x1c4] ss:$8 sps:$4 sm:$0xff]  }
  0x38   :  { %v107_v19 = vadd.f32 %v106_v14, %v105_v16  ;;  %v1163_v21 = vpop.eup %1162  ;;  %v112_v23 = vsel %vm100_vm0, %v1161_v18, 0.0  ;;  %v1102_v14 = vld [vmem:[#allocation3 + $0xc4] ss:$8 sps:$4 sm:$0xff]   ;;  %v1100_v16 = vld [vmem:[#allocation3 + $0xc0] ss:$8 sps:$4 sm:$0xff]  }
  0x39   :  { %v114_v25 = vsel %vm100_vm0, %v1163_v21, 0.0  ;;  %v1108_v18 = vld [vmem:[#allocation3 + $0xb4] ss:$8 sps:$4 sm:$0xff]   ;;  %v1109_v21 = vld [vmem:[#allocation3 + $0x1b0] ss:$8 sps:$4 sm:$0xff]  }
  0x3a   :  { %v109_v22 = vadd.f32 %v108_v17, %v107_v19  ;;  %v1103_v17 = vld [vmem:[#allocation3 + $0x1c0] ss:$8 sps:$4 sm:$0xff]   ;;  %v1111_v19 = vld [vmem:[#allocation3 + $0x1b4] ss:$8 sps:$4 sm:$0xff]  }
  0x3c   :  { %v111_v24 = vadd.f32 %v110_v20, %v109_v22  ;;  %v1106_v20 = vld [vmem:[#allocation3 + $0xb0] ss:$8 sps:$4 sm:$0xff]   ;;  %v1114_v22 = vld [vmem:[#allocation3 + $0xa4] ss:$8 sps:$4 sm:$0xff]  }
  0x3e   :  { %v113_v26 = vadd.f32 %v112_v23, %v111_v24  ;;  %v1117_v23 = vld [vmem:[#allocation3 + $0x1a4] ss:$8 sps:$4 sm:$0xff]   ;;  %v1112_v24 = vld [vmem:[#allocation3 + $0xa0] ss:$8 sps:$4 sm:$0xff]  }
  0x40   :  { %v115_v27 = vadd.f32 %v114_v25, %v113_v26  ;;  %v1115_v25 = vld [vmem:[#allocation3 + $0x1a0] ss:$8 sps:$4 sm:$0xff]   ;;  %v1120_v26 = vld [vmem:[#allocation3 + $0x94] ss:$8 sps:$4 sm:$0xff]  }
  0x42   :  { %v117_v28 = vmul.f32 0.125, %v115_v27  ;;  %v1123_v27 = vld [vmem:[#allocation3 + $0x194] ss:$8 sps:$4 sm:$0xff]  }
  0x44   :  { %1164 = vlog2.f32 %v117_v28  ;;  %v1118_v28 = vld [vmem:[#allocation3 + $0x90] ss:$8 sps:$4 sm:$0xff]  }
  0x4d   :  { %s1005_s2 = spop %1004 }
  0x4e   :  { %v120_v30 = vstv %s1005_s2 }
  0x51   :  { %v1165_v29 = vpop.eup %1164 }
  0x52   :  { %v119_v31 = vmul.f32 0.6931472, %v1165_v29  ;;  %v1121_v29 = vld [vmem:[#allocation3 + $0x190] ss:$8 sps:$4 sm:$0xff]  }
  0x54   :  { %v121_v32 = vmul.f32 %v120_v30, %v119_v31  ;;  %v1126_v30 = vld [vmem:[#allocation3 + $0x84] ss:$8 sps:$4 sm:$0xff]  }
  0x55   :  { %v1129_v31 = vld [vmem:[#allocation3 + $0x184] ss:$8 sps:$4 sm:$0xff]  }
  0x56   :  { %v122_v33 = vmul.f32 1.442695, %v121_v32  ;;  %v1124_v32 = vld [vmem:[#allocation3 + $0x80] ss:$8 sps:$4 sm:$0xff]  }
  0x58   :  { %1166 = vpow2.f32 %v122_v33  ;;  %v1127_v33 = vld [vmem:[#allocation3 + $0x180] ss:$8 sps:$4 sm:$0xff]  }
  0x65   :  { %v1167_v34 = vpop.eup %1166 }
  0x66   :  { %v124_v37 = vpack.c.bf16 %v1167_v34, %v1167_v34  ;;  %v143_v34 = vlaneseq }
  0x68   :  { %934 = vmatmul.mubr.msk.bf16.vlgmr.msra.gmra.mxu0 %vm100_vm0, %v124_v37  ;;  %935 = vmatmul.mubr.msk.bf16.vlgmr.msra.gmra.mxu1 %vm100_vm0, %v124_v37 }
  0x69   :  { %733 = vmatpush1.bf16.msra.mxu0 %v1034_v35  ;;  %774 = vmatpush1.bf16.msra.mxu1 %v1037_v36  ;;  %v144_v35 = vshrl.u32 %v143_v34, 7 }
  0x6a   :  { %734 = vmatprep.subr.bf16.mxu0 %v1042_v38  ;;  %775 = vmatprep.subr.bf16.mxu1 %v1045_v39  ;;  %v141_v38 = vld [vmem:[%s1376_s3] sm:$0xf] }
  0x6b   :  { %v145_v36 = vsub.s32 0, %v144_v35  ;;  %v153_v37 = vsub.s32 2, %v144_v35  ;;  %v149_v39 = vsub.s32 1, %v144_v35 }
  0x6d   :  { %735 = vmatpush1.bf16.msra.mxu0 %v1040_v40  ;;  %776 = vmatpush1.bf16.msra.mxu1 %v1043_v41  ;;  %v157_v40 = vsub.s32 3, %v144_v35  ;;  %v146_v41 = vrot.slane %v141_v38, %v145_v36 }
  0x6e   :  { %736 = vmatprep.subr.bf16.mxu0 %v1048_v42  ;;  %777 = vmatprep.subr.bf16.mxu1 %v1051_v43  ;;  %v154_v42 = vrot.slane %v141_v38, %v153_v37  ;;  %v150_v43 = vrot.slane %v141_v38, %v149_v39 }
  0x71   :  { %737 = vmatpush1.bf16.msra.mxu0 %v1046_v44  ;;  %778 = vmatpush1.bf16.msra.mxu1 %v1049_v45  ;;  %v158_v44 = vrot.slane %v141_v38, %v157_v40 }
  0x72   :  { %738 = vmatprep.subr.bf16.mxu0 %v1054_v46  ;;  %779 = vmatprep.subr.bf16.mxu1 %v1057_v47 }
  0x75   :  { %739 = vmatpush1.bf16.msra.mxu0 %v1052_v48  ;;  %780 = vmatpush1.bf16.msra.mxu1 %v1055_v49 }
  0x76   :  { %740 = vmatprep.subr.bf16.mxu0 %v1060_v50  ;;  %781 = vmatprep.subr.bf16.mxu1 %v1063_v51 }
  0x79   :  { %741 = vmatpush1.bf16.msra.mxu0 %v1058_v52  ;;  %782 = vmatpush1.bf16.msra.mxu1 %v1061_v53 }
  0x7a   :  { %742 = vmatprep.subr.bf16.mxu0 %v1066_v54  ;;  %783 = vmatprep.subr.bf16.mxu1 %v1069_v55 }
  0x7d   :  { %743 = vmatpush1.bf16.msra.mxu0 %v1064_v56  ;;  %784 = vmatpush1.bf16.msra.mxu1 %v1067_v57 }
  0x7e   :  { %744 = vmatprep.subr.bf16.mxu0 %v1072_v58  ;;  %785 = vmatprep.subr.bf16.mxu1 %v1075_v59 }
  0x81   :  { %745 = vmatpush1.bf16.msra.mxu0 %v1070_v60  ;;  %786 = vmatpush1.bf16.msra.mxu1 %v1073_v61 }
  0x82   :  { %746 = vmatprep.subr.bf16.mxu0 %v1078_v62  ;;  %787 = vmatprep.subr.bf16.mxu1 %v1081_v63 }
  0x85   :  { %747 = vmatpush1.bf16.msra.mxu0 %v1076_v1  ;;  %788 = vmatpush1.bf16.msra.mxu1 %v1079_v2  ;;  %v400_v2 = vld [vmem:[%s1378_s5] sm:$0x3] }
  0x86   :  { %748 = vmatprep.subr.bf16.mxu0 %v1084_v3  ;;  %789 = vmatprep.subr.bf16.mxu1 %v1087_v4  ;;  %v405_v3 = vrot.slane %v400_v2, %v145_v36  ;;  %v409_v4 = vrot.slane %v400_v2, %v149_v39 }
  0x89   :  { %749 = vmatpush2.bf16.msra.mxu0 %v1082_v5  ;;  %790 = vmatpush2.bf16.msra.mxu1 %v1085_v6 }
  0x8a   :  { %750 = vmatprep.subr.bf16.mxu0 %v1090_v7  ;;  %791 = vmatprep.subr.bf16.mxu1 %v1093_v8 }
  0x8d   :  { %751 = vmatpush2.bf16.msra.mxu0 %v1088_v9  ;;  %792 = vmatpush2.bf16.msra.mxu1 %v1091_v10 }
  0x8e   :  { %752 = vmatprep.subr.bf16.mxu0 %v1096_v11  ;;  %793 = vmatprep.subr.bf16.mxu1 %v1099_v12 }
  0x91   :  { %753 = vmatpush2.bf16.msra.mxu0 %v1094_v0  ;;  %794 = vmatpush2.bf16.msra.mxu1 %v1097_v13 }
  0x92   :  { %754 = vmatprep.subr.bf16.mxu0 %v1102_v14  ;;  %795 = vmatprep.subr.bf16.mxu1 %v1105_v15 }
  0x95   :  { %755 = vmatpush2.bf16.msra.mxu0 %v1100_v16  ;;  %796 = vmatpush2.bf16.msra.mxu1 %v1103_v17 }
  0x96   :  { %756 = vmatprep.subr.bf16.mxu0 %v1108_v18  ;;  %797 = vmatprep.subr.bf16.mxu1 %v1111_v19 }
  0x99   :  { %757 = vmatpush2.bf16.msra.mxu0 %v1106_v20  ;;  %798 = vmatpush2.bf16.msra.mxu1 %v1109_v21 }
  0x9a   :  { %758 = vmatprep.subr.bf16.mxu0 %v1114_v22  ;;  %799 = vmatprep.subr.bf16.mxu1 %v1117_v23 }
  0x9d   :  { %759 = vmatpush2.bf16.msra.mxu0 %v1112_v24  ;;  %800 = vmatpush2.bf16.msra.mxu1 %v1115_v25 }
  0x9e   :  { %760 = vmatprep.subr.bf16.mxu0 %v1120_v26  ;;  %801 = vmatprep.subr.bf16.mxu1 %v1123_v27 }
  0xa1   :  { %761 = vmatpush2.bf16.msra.mxu0 %v1118_v28  ;;  %802 = vmatpush2.bf16.msra.mxu1 %v1121_v29 }
  0xa2   :  { %762 = vmatprep.subr.bf16.mxu0 %v1126_v30  ;;  %803 = vmatprep.subr.bf16.mxu1 %v1129_v31 }
  0xa5   :  { %763 = vmatpush2.bf16.msra.mxu0 %v1124_v32  ;;  %804 = vmatpush2.bf16.msra.mxu1 %v1127_v33 }
 0x128   :  { %v280_v45 = vpop.f32.mrf.mxu0  ;;  %v321_v46 = vpop.f32.mrf.mxu1 }
 0x129   :  { %v281_v47 = vadd.f32 %v280_v45, %v146_v41  ;;  %v322_v48 = vadd.f32 %v321_v46, %v154_v42 }
 0x12a   :  { %v282_v49 = vpop.f32.mrf.mxu0  ;;  %v323_v50 = vpop.f32.mrf.mxu1 }
 0x12b   :  { %v283_v51 = vadd.f32 %v282_v49, %v150_v43  ;;  %v324_v52 = vadd.f32 %v323_v50, %v158_v44  ;;  %v328_v53 = vmax.f32 %v281_v47, 0.0  ;;  %v330_v54 = vmax.f32 %v322_v48, 0.0 }
 0x12c   :  { %v284_v55 = vpop.f32.mrf.mxu0  ;;  %v325_v56 = vpop.f32.mrf.mxu1 }
 0x12d   :  { %v329_v57 = vmax.f32 %v283_v51, 0.0  ;;  %v331_v58 = vmax.f32 %v324_v52, 0.0  ;;  %v332_v63 = vpack.c.bf16 %v328_v53, %v328_v53  ;;  %v334_v1 = vpack.c.bf16 %v330_v54, %v330_v54 }
 0x12e   :  { %v285_v59 = vpop.f32.mrf.mxu0  ;;  %v326_v60 = vpop.f32.mrf.mxu1 }
 0x12f   :  { %v333_v61 = vpack.c.bf16 %v329_v57, %v329_v57  ;;  %v335_v62 = vpack.c.bf16 %v331_v58, %v331_v58 }
 0x131   :  { %764 = vmatprep.mubr.bf16.mxu0 %v333_v61  ;;  %805 = vmatprep.mubr.bf16.mxu1 %v335_v62 }
 0x132   :  { %765 = vmatmul.mubr.bf16.vlgmr.msra.gmra.mxu0 %v332_v63  ;;  %806 = vmatmul.mubr.bf16.vlgmr.msra.gmra.mxu1 %v334_v1 }
 0x1f2   :  { %v766_v5 = vpop.f32.mrf.mxu0  ;;  %v807_v6 = vpop.f32.mrf.mxu1 }
 0x1f3   :  { %v767_v7 = vadd.f32 %v766_v5, %v405_v3 }
 0x1f4   :  { %v768_v8 = vpop.f32.mrf.mxu0  ;;  %v809_v9 = vpop.f32.mrf.mxu1 }
 0x1f5   :  { %v808_v10 = vadd.f32 %v807_v6, %v767_v7  ;;  %v769_v11 = vadd.f32 %v768_v8, %v409_v4 }
 0x1f6   :  { %v770_v12 = vpop.f32.mrf.mxu0  ;;  %v811_v0 = vpop.f32.mrf.mxu1 }
 0x1f7   :  { %1168 = vtanh.f32 %v808_v10  ;;  %v810_v13 = vadd.f32 %v809_v9, %v769_v11 }
 0x1f8   :  { %v771_v14 = vpop.f32.mrf.mxu0  ;;  %v812_v15 = vpop.f32.mrf.mxu1 }
 0x1f9   :  { %v815_v16 = vsub.f32 0.0, %v810_v13  ;;  %858 = vst [vmem:[%s1379_s6] ss:$16 sps:$4 sm:$0xff] %v810_v13  }
 0x1fb   :  { %v816_v17 = vmul.f32 1.442695, %v815_v16 }
 0x1fd   :  { %1170 = vpow2.f32 %v816_v17 }
 0x204   :  { %v1169_v18 = vpop.eup %1168 }
 0x205   :  { %859 = vst [vmem:[%s1379_s6 + $0x4] ss:$16 sps:$4 sm:$0xff] %v1169_v18   ;;  %v822_v19 = vsel %vm821_vm1, %v1169_v18, -inf  ;;  %v863_v20 = vsel %vm862_vm2, %v1169_v18, -inf }
 0x206   :  { %v823_v21 = vrot.slane %v822_v19, 4  ;;  %v864_v22 = vrot.slane %v863_v20, 4 }
 0x208   :  { %v824_v23 = vmax.f32 %v822_v19, %v823_v21  ;;  %v865_v24 = vmax.f32 %v863_v20, %v864_v22 }
 0x20a   :  { %v825_v25 = vrot.slane %v824_v23, 2  ;;  %v866_v26 = vrot.slane %v865_v24, 2  ;;  %v1171_v29 = vpop.eup %1170 }
 0x20b   :  { %v818_v34 = vadd.f32 1.0, %v1171_v29 }
 0x20c   :  { %v826_v27 = vmax.f32 %v824_v23, %v825_v25  ;;  %v867_v28 = vmax.f32 %v865_v24, %v866_v26 }
 0x20d   :  { %1172 = vrcp.f32 %v818_v34 }
 0x20e   :  { %v827_v30 = vrot.slane %v826_v27, 1  ;;  %v868_v31 = vrot.slane %v867_v28, 1 }
 0x210   :  { %v828_v32 = vmax.f32 %v826_v27, %v827_v30  ;;  %v869_v33 = vmax.f32 %v867_v28, %v868_v31 }
 0x212   :  { %v829_v35 = vsub.f32 %v1169_v18, %v828_v32  ;;  %v870_v36 = vsub.f32 %v1169_v18, %v869_v33 }
 0x214   :  { %v830_v37 = vmul.f32 1.442695, %v829_v35  ;;  %v871_v38 = vmul.f32 1.442695, %v870_v36 }
 0x216   :  { %1174 = vpow2.f32 %v830_v37 }
 0x217   :  { %1176 = vpow2.f32 %v871_v38 }
 0x21a   :  { %v1173_v39 = vpop.eup %1172 }
 0x223   :  { %v1175_v40 = vpop.eup %1174 }
 0x224   :  { %v1177_v41 = vpop.eup %1176  ;;  %v832_v42 = vsel %vm821_vm1, %v1175_v40, 0.0  ;;  %v840_v43 = vmul.f32 %v1175_v40, %v810_v13  ;;  %v849_v44 = vmul.f32 %v1175_v40, %v1173_v39 }
 0x225   :  { %v833_v45 = vrot.slane %v832_v42, 4  ;;  %v874_v46 = vrot.slane %v1177_v41, 4  ;;  %v884_v47 = vmul.f32 %v1177_v41, %v810_v13  ;;  %v896_v48 = vmul.f32 %v1177_v41, %v1173_v39 }
 0x226   :  { %v841_v49 = vsel %vm821_vm1, %v840_v43, 0.0  ;;  %v850_v50 = vsel %vm821_vm1, %v849_v44, 0.0 }
 0x227   :  { %v834_v51 = vadd.f32 %v833_v45, %v832_v42  ;;  %v876_v52 = vsel %vm821_vm1, %v874_v46, 0.0  ;;  %v886_v54 = vrot.slane %v884_v47, 4  ;;  %v898_v55 = vrot.slane %v896_v48, 4 }
 0x228   :  { %v877_v53 = vrot.slane %v876_v52, 4  ;;  %v842_v57 = vrot.slane %v841_v49, 4  ;;  %v851_v58 = vrot.slane %v850_v50, 4 }
 0x229   :  { %v835_v56 = vrot.slane %v834_v51, 2  ;;  %v888_v60 = vsel %vm821_vm1, %v886_v54, 0.0  ;;  %v900_v61 = vsel %vm821_vm1, %v898_v55, 0.0 }
 0x22a   :  { %v878_v59 = vadd.f32 %v877_v53, %v876_v52  ;;  %v889_v1 = vrot.slane %v888_v60, 4  ;;  %v901_v2 = vrot.slane %v900_v61, 4  ;;  %v843_v4 = vadd.f32 %v842_v57, %v841_v49 }
 0x22b   :  { %v836_v62 = vadd.f32 %v835_v56, %v834_v51  ;;  %v852_v5 = vadd.f32 %v851_v58, %v850_v50 }
 0x22c   :  { %v879_v63 = vrot.slane %v878_v59, 2  ;;  %v890_v9 = vadd.f32 %v889_v1, %v888_v60  ;;  %v902_v10 = vadd.f32 %v901_v2, %v900_v61  ;;  %v844_v11 = vrot.slane %v843_v4, 2 }
 0x22d   :  { %v837_v3 = vrot.slane %v836_v62, 1  ;;  %v853_v12 = vrot.slane %v852_v5, 2 }
 0x22e   :  { %v880_v6 = vadd.f32 %v879_v63, %v878_v59  ;;  %v891_v13 = vrot.slane %v890_v9, 2  ;;  %v903_v14 = vrot.slane %v902_v10, 2  ;;  %v845_v15 = vadd.f32 %v844_v11, %v843_v4 }
 0x22f   :  { %v838_v7 = vadd.f32 %v837_v3, %v836_v62  ;;  %v854_v16 = vadd.f32 %v853_v12, %v852_v5 }
 0x230   :  { %v881_v8 = vrot.slane %v880_v6, 1  ;;  %v892_v17 = vadd.f32 %v891_v13, %v890_v9  ;;  %v904_v18 = vadd.f32 %v903_v14, %v902_v10  ;;  %v846_v19 = vrot.slane %v845_v15, 1 }
 0x231   :  { %1178 = vrcp.f32 %v838_v7  ;;  %v855_v20 = vrot.slane %v854_v16, 1 }
 0x232   :  { %v882_v0 = vadd.f32 %v881_v8, %v880_v6  ;;  %v893_v21 = vrot.slane %v892_v17, 1  ;;  %v905_v22 = vrot.slane %v904_v18, 1  ;;  %v847_v23 = vadd.f32 %v846_v19, %v845_v15 }
 0x233   :  { %v856_v24 = vadd.f32 %v855_v20, %v854_v16 }
 0x234   :  { %1180 = vrcp.f32 %v882_v0  ;;  %v894_v28 = vadd.f32 %v893_v21, %v892_v17  ;;  %v906_v29 = vadd.f32 %v905_v22, %v904_v18 }
 0x23e   :  { %v1179_v25 = vpop.eup %1178 }
 0x23f   :  { %v848_v26 = vmul.f32 %v1179_v25, %v847_v23  ;;  %v857_v27 = vmul.f32 %v1179_v25, %v856_v24 }
 0x241   :  { %v1181_v30 = vpop.eup %1180  ;;  %860 = vst [vmem:[%s1379_s6 + $0x8] sm:$0x1] %v848_v26  ;;  %861 = vst [vmem:[%s1379_s6 + $0x9] sm:$0x1] %v857_v27 }
 0x242   :  { %v895_v31 = vmul.f32 %v1181_v30, %v894_v28  ;;  %v907_v32 = vmul.f32 %v1181_v30, %v906_v29 }
 0x244   :  { %1002 = vst [vmem:[%s1379_s6 + $0x18] sm:$0x1] %v895_v31  ;;  %1003 = vst [vmem:[%s1379_s6 + $0x19] sm:$0x1] %v907_v32 }
 0x245   :  { %917 = vsyncpa [#allocation4], 1 }

</bundles_post_ra>
